<compile_context>
chip_gen: v7x
topology: tpu7x:2x2x1
jax: 0.10.0
libtpu: 0.0.40
codegen_flags: <defaults>
</compile_context>

<pallas_src>
import functools
from math import sqrt

import jax
import jax.numpy as jnp
from jax.experimental import pallas as pl
from jax.experimental.pallas import tpu as pltpu

LANE = 128      # padded feature (lane) width: all activations/weights live in a 128-lane slab
SUBLANE = 8     # f32 sublane granularity for the batch axis


# ------------------------------- fused Pallas kernel ---------------------------------

def _emlp_fused_kernel(x_ref, wt_ref, b_ref, pv_ref, gx_ref, st_ref,
                       gate_ref, mask_ref, wft_ref, bf_ref, o_ref, *, num_blocks):
    """Whole EMLP forward for one batch tile, VMEM-resident between stages.

    Per block (torch EMLPBlock):
      lin    = x @ W.T + b                                   (EquivariantLinear)
      preact = 0.1 * bilinear(lin) + lin                     (EquivariantBiLinear + residual)
      h      = sigmoid(preact[:, gate_idx]) * preact[:, :C]  (GatedNonlinearity)
    then a final EquivariantLinear.

    bilinear() is the sparse fold of the torch index_select/matmul/scatter/invperm loop:
      bilinear(lin) = ((lin @ Pv) * (lin @ Gx)) @ ST
    where Pv carries the per-rep small matmul and Gx/ST are one-hot gather/scatter maps.
    The gate gather is a one-hot (P,P) matmul; a (1,P) mask zeroes the padded lanes >= C.
    """
    h = x_ref[...]                                            # (Bt, P) f32; padded lanes = 0
    for l in range(num_blocks):                               # static, unrolled
        # EquivariantLinear
        lin = jnp.dot(h, wt_ref[l], preferred_element_type=jnp.float32) + b_ref[l]
        # EquivariantBiLinear (sparse fold) + residual
        v = jnp.dot(lin, pv_ref[l], preferred_element_type=jnp.float32)    # (Bt, Kp)
        xg = jnp.dot(lin, gx_ref[l], preferred_element_type=jnp.float32)   # (Bt, Kp)
        preact = 0.1 * jnp.dot(v * xg, st_ref[l],
                               preferred_element_type=jnp.float32) + lin   # (Bt, P)
        # GatedNonlinearity
        gates = jnp.dot(preact, gate_ref[...], preferred_element_type=jnp.float32)
        h = jax.nn.sigmoid(gates) * preact * mask_ref[...]
    # Final EquivariantLinear
    y = jnp.dot(h, wft_ref[...], preferred_element_type=jnp.float32) + bf_ref[...]
    o_ref[...] = y.astype(o_ref.dtype)


@functools.partial(jax.jit, static_argnames=("n_out",))
def _emlp_forward_impl(x, WT_s, b_s, Pv_s, Gx_s, ST_s, gateT, maskC, WfT, bf, *, n_out):
    B, n_in = x.shape
    L, P, _ = WT_s.shape
    Kp = Pv_s.shape[-1]

    # pad batch (sublane) up to the tile, features (lane) up to P=128
    b_tile = min(max(SUBLANE, -(-B // SUBLANE) * SUBLANE), 256)
    Bp = -(-B // b_tile) * b_tile
    x_pad = jnp.zeros((Bp, P), x.dtype).at[:B, :n_in].set(x)

    y_pad = pl.pallas_call(
        functools.partial(_emlp_fused_kernel, num_blocks=L),
        out_shape=jax.ShapeDtypeStruct((Bp, P), x.dtype),
        grid_spec=pltpu.PrefetchScalarGridSpec(
            num_scalar_prefetch=0,
            grid=(Bp // b_tile,),
            in_specs=[
                pl.BlockSpec((b_tile, P), lambda i: (i, 0)),    # x batch tile
                pl.BlockSpec((L, P, P), lambda i: (0, 0, 0)),   # stacked padded W.T
                pl.BlockSpec((L, 1, P), lambda i: (0, 0, 0)),   # stacked padded b
                pl.BlockSpec((L, P, Kp), lambda i: (0, 0, 0)),  # bilinear Pv
                pl.BlockSpec((L, P, Kp), lambda i: (0, 0, 0)),  # bilinear gather Gx
                pl.BlockSpec((L, Kp, P), lambda i: (0, 0, 0)),  # bilinear scatter ST
                pl.BlockSpec((P, P), lambda i: (0, 0)),         # gate-index one-hot
                pl.BlockSpec((1, P), lambda i: (0, 0)),         # valid-output-lane mask
                pl.BlockSpec((P, P), lambda i: (0, 0)),         # final padded W.T
                pl.BlockSpec((1, P), lambda i: (0, 0)),         # final padded b
            ],
            out_specs=pl.BlockSpec((b_tile, P), lambda i: (i, 0)),
        ),
        compiler_params=pltpu.CompilerParams(
            dimension_semantics=("parallel",)),                 # batch axis -> both TCs on v7x
    )(x_pad, WT_s, b_s, Pv_s, Gx_s, ST_s, gateT, maskC, WfT, bf)
    return y_pad[:B, :n_out]


def emlp_forward(x, p):
    return _emlp_forward_impl(
        x, p["WT_s"], p["b_s"], p["Pv_s"], p["Gx_s"], p["ST_s"],
        p["gateT"], p["maskC"], p["WfT"], p["bf"], n_out=p["n_out"])


# --------------------------- parameter construction ----------------------------

def orthogonal_init(key, n_out, n_in):
    # Mimics nn.init.orthogonal_ (semi-orthogonal) deterministically.
    a = jax.random.normal(key, (max(n_out, n_in), min(n_out, n_in)), dtype=jnp.float32)
    q, r = jnp.linalg.qr(a)
    diag = jnp.diagonal(r)
    q = q * jnp.where(diag == 0, 1.0, jnp.sign(diag))
    if n_out < n_in:
        q = q.T
    return q[:n_out, :n_in]


def _sparse_bilinear_fold(Dg, n, rep_size, W_mult, bid, Wbil, W_invperm, sl_start):
    """Fold the torch bilinear loop into three small matrices.

    bilinear(x)[b, i] = sum_{q: i_q == i} v[b, q] * x[b, j_q]
      v = x @ Pv, with v[b, m*rep_size+r] = sum_j Wm[m, j] * x[b, bid[j*rep_size+r]]
      (i_q, j_q): the unique position with W_invperm[i_q*Dg + j_q] == sl_start + q.
    """
    K = W_mult * rep_size
    Wm = Wbil.reshape(W_mult, n)
    mm, jj, rr = jnp.meshgrid(jnp.arange(W_mult), jnp.arange(n), jnp.arange(rep_size),
                              indexing="ij")
    rows = jnp.asarray(bid)[(jj * rep_size + rr).reshape(-1)]
    cols = (mm * rep_size + rr).reshape(-1)
    vals = Wm[mm.reshape(-1), jj.reshape(-1)]
    Pv = jnp.zeros((Dg, K), jnp.float32).at[rows, cols].set(vals)

    inv = jnp.argsort(W_invperm)                 # inv[v] = position of value v in W_invperm
    pos = inv[sl_start + jnp.arange(K)]
    i_q, j_q = pos // Dg, pos % Dg
    Gx = jnp.zeros((Dg, K), jnp.float32).at[j_q, jnp.arange(K)].set(1.0)
    ST = jnp.zeros((K, Dg), jnp.float32).at[jnp.arange(K), i_q].set(1.0)
    return Pv, Gx, ST


def make_params(key, d, n_s, n_v, n_in, n_out, num_blocks):
    C = n_s + n_v * d            # ungated hidden rep size (block output)
    Dg = C + n_v                 # gated hidden rep size (one scalar gate per vector copy)
    rep_size, n, W_mult = d, n_v, 6
    K = W_mult * rep_size
    sl_start = 0
    P, Kp = LANE, LANE
    assert max(Dg, n_in, n_out) <= P and K <= Kp

    bid = jnp.arange(n_s, n_s + n_v * d, dtype=jnp.int32)   # vector channels of the gated rep
    # gate_indices: scalars gate themselves; each vector copy j is gated by channel C+j
    gate_indices = jnp.asarray(
        list(range(n_s)) + [C + j for j in range(n_v) for _ in range(d)], dtype=jnp.int32)
    gateT = jnp.zeros((P, P), jnp.float32).at[gate_indices, jnp.arange(C)].set(1.0)
    maskC = jnp.zeros((1, P), jnp.float32).at[0, :C].set(1.0)

    blocks, WT_l, b_l, Pv_l, Gx_l, ST_l = [], [], [], [], [], []
    r_in = n_in
    for _ in range(num_blocks):
        key, k1, k2, k3, k4 = jax.random.split(key, 5)
        W = orthogonal_init(k1, Dg, r_in)                          # Pw = identity projector
        b = jax.random.uniform(k2, (Dg,), jnp.float32) / sqrt(Dg)  # Pb = identity projector
        Wbil = jax.random.normal(k3, (n * W_mult,), jnp.float32)
        W_invperm = jax.random.permutation(k4, Dg * Dg)
        Pv, Gx, ST = _sparse_bilinear_fold(Dg, n, rep_size, W_mult, bid, Wbil,
                                           W_invperm, sl_start)
        WT_l.append(jnp.zeros((P, P), jnp.float32).at[:r_in, :Dg].set(W.T))
        b_l.append(jnp.zeros((1, P), jnp.float32).at[0, :Dg].set(b))
        Pv_l.append(jnp.zeros((P, Kp), jnp.float32).at[:Dg, :K].set(Pv))
        Gx_l.append(jnp.zeros((P, Kp), jnp.float32).at[:Dg, :K].set(Gx))
        ST_l.append(jnp.zeros((Kp, P), jnp.float32).at[:K, :Dg].set(ST))
        blocks.append(dict(W=W, b=b, Wbil=Wbil, W_invperm=W_invperm))
        r_in = C

    key, k1, k2 = jax.random.split(key, 3)
    Wf = orthogonal_init(k1, n_out, C)
    bf = jax.random.uniform(k2, (n_out,), jnp.float32) / sqrt(n_out)

    return dict(
        # padded / stacked tensors consumed by the fused Pallas kernel
        WT_s=jnp.stack(WT_l), b_s=jnp.stack(b_l),
        Pv_s=jnp.stack(Pv_l), Gx_s=jnp.stack(Gx_l), ST_s=jnp.stack(ST_l),
        gateT=gateT, maskC=maskC,
        WfT=jnp.zeros((P, P), jnp.float32).at[:C, :n_out].set(Wf.T),
        bf=jnp.zeros((1, P), jnp.float32).at[0, :n_out].set(bf),
        n_out=n_out,
        # raw per-block params + rep metadata for the pure-JAX reference
        blocks=blocks, Wf=Wf, bf_raw=bf, gate_indices=gate_indices,
        C=C, Dg=Dg, n=n, rep_size=rep_size, W_mult=W_mult, bid=bid,
        sl=slice(sl_start, sl_start + K))


# -------------------- pure-JAX reference (mirrors the torch code) ---------------------

def _ref_bilinear(x, p, blk):
    B, Dg = x.shape
    W_proj = jnp.zeros((B, Dg * Dg), x.dtype)
    x_rep = x[:, p["bid"]].T.reshape(p["n"], p["rep_size"] * B)
    x_proj = blk["Wbil"].reshape(p["W_mult"], p["n"]) @ x_rep
    W_proj = W_proj.at[:, p["sl"]].set(x_proj.reshape(p["W_mult"] * p["rep_size"], B).T)
    Wp = W_proj[:, blk["W_invperm"]].reshape(B, Dg, Dg)
    return 0.1 * jnp.einsum("bij,bj->bi", Wp, x)


def ref_emlp(x, p):
    h = x
    for blk in p["blocks"]:
        lin = h @ blk["W"].T + blk["b"]
        preact = _ref_bilinear(lin, p, blk) + lin
        h = jax.nn.sigmoid(preact[..., p["gate_indices"]]) * preact[..., :p["C"]]
    return h @ p["Wf"].T + p["bf_raw"]


# ------------------------------------ main --------------------------------------

if __name__ == "__main__":
    d, n_s, n_v = 3, 8, 4        # group dim, #scalar copies, #vector copies in hidden rep
    n_in, n_out = 7, 3           # repin size (1 scalar + 2 vectors), repout size (1 vector)
    num_blocks = 2
    B = 4

    key = jax.random.PRNGKey(0)
    key, kx = jax.random.split(key)
    params = make_params(key, d, n_s, n_v, n_in, n_out, num_blocks)
    x = jax.random.normal(kx, (B, n_in), dtype=jnp.float32)

    y = emlp_forward(x, params)
    y = jax.block_until_ready(y)

    y_ref = ref_emlp(x, params)
    err = jnp.max(jnp.abs(y - y_ref)) / (jnp.max(jnp.abs(y_ref)) + 1e-6)
    assert y.shape == (B, n_out)
    assert bool(err < 1e-3), f"mismatch vs reference, rel err {err}"

    print("KERNEL_OK")
</pallas_src>

<mosaic_0001>
module attributes {stable_mosaic.version = 11 : i64} {
  func.func @_emlp_fused_kernel(%arg0: i32, %arg1: memref<8x128xf32, #tpu.memory_space<vmem>>, %arg2: memref<2x128x128xf32, #tpu.memory_space<vmem>>, %arg3: memref<2x1x128xf32, #tpu.memory_space<vmem>>, %arg4: memref<2x128x128xf32, #tpu.memory_space<vmem>>, %arg5: memref<2x128x128xf32, #tpu.memory_space<vmem>>, %arg6: memref<2x128x128xf32, #tpu.memory_space<vmem>>, %arg7: memref<128x128xf32, #tpu.memory_space<vmem>>, %arg8: memref<1x128xf32, #tpu.memory_space<vmem>>, %arg9: memref<128x128xf32, #tpu.memory_space<vmem>>, %arg10: memref<1x128xf32, #tpu.memory_space<vmem>>, %arg11: memref<8x128xf32, #tpu.memory_space<vmem>>) attributes {dimension_semantics = [#tpu.dimension_semantics<parallel>], iteration_bounds = array<i64: 1>, scalar_prefetch = 0 : i64, scratch_operands = 0 : i64, tpu.core_type = #tpu.core_type<tc>, window_params = [{transform_indices = @transform_0, window_bounds = array<i64: 8, 128>}, {pipeline_mode = #tpu.pipeline_mode<synchronous>, transform_indices = @transform_1, window_bounds = array<i64: 2, 128, 128>}, {pipeline_mode = #tpu.pipeline_mode<synchronous>, transform_indices = @transform_2, window_bounds = array<i64: 2, 1, 128>}, {pipeline_mode = #tpu.pipeline_mode<synchronous>, transform_indices = @transform_3, window_bounds = array<i64: 2, 128, 128>}, {pipeline_mode = #tpu.pipeline_mode<synchronous>, transform_indices = @transform_4, window_bounds = array<i64: 2, 128, 128>}, {pipeline_mode = #tpu.pipeline_mode<synchronous>, transform_indices = @transform_5, window_bounds = array<i64: 2, 128, 128>}, {pipeline_mode = #tpu.pipeline_mode<synchronous>, transform_indices = @transform_6, window_bounds = array<i64: 128, 128>}, {pipeline_mode = #tpu.pipeline_mode<synchronous>, transform_indices = @transform_7, window_bounds = array<i64: 1, 128>}, {pipeline_mode = #tpu.pipeline_mode<synchronous>, transform_indices = @transform_8, window_bounds = array<i64: 128, 128>}, {pipeline_mode = #tpu.pipeline_mode<synchronous>, transform_indices = @transform_9, window_bounds = array<i64: 1, 128>}, {transform_indices = @transform_10, window_bounds = array<i64: 8, 128>}]} {
    %c0 = arith.constant 0 : index
    %c0_0 = arith.constant 0 : index
    %0 = vector.load %arg1[%c0, %c0_0] : memref<8x128xf32, #tpu.memory_space<vmem>>, vector<8x128xf32>
    %c0_1 = arith.constant 0 : index
    %c0_2 = arith.constant 0 : index
    %c0_3 = arith.constant 0 : index
    %1 = vector.load %arg2[%c0_1, %c0_2, %c0_3] : memref<2x128x128xf32, #tpu.memory_space<vmem>>, vector<1x128x128xf32>
    %2 = vector.shape_cast %1 : vector<1x128x128xf32> to vector<128x128xf32>
    %cst = arith.constant dense<0.000000e+00> : vector<8x128xf32>
    %3 = tpu.matmul %0, %2, %cst {dimension_numbers = #tpu.dot_dimension_numbers<[1], [0], [0], [1], [0, 0, 1, 1], [], []>} : vector<8x128xf32>, vector<128x128xf32>, vector<8x128xf32> -> vector<8x128xf32>
    %c0_4 = arith.constant 0 : index
    %c0_5 = arith.constant 0 : index
    %c0_6 = arith.constant 0 : index
    %4 = vector.load %arg3[%c0_4, %c0_5, %c0_6] : memref<2x1x128xf32, #tpu.memory_space<vmem>>, vector<1x1x128xf32>
    %5 = vector.shape_cast %4 : vector<1x1x128xf32> to vector<1x128xf32>
    %6 = vector.broadcast %5 : vector<1x128xf32> to vector<8x128xf32>
    %7 = arith.addf %3, %6 : vector<8x128xf32>
    %c0_7 = arith.constant 0 : index
    %c0_8 = arith.constant 0 : index
    %c0_9 = arith.constant 0 : index
    %8 = vector.load %arg4[%c0_7, %c0_8, %c0_9] : memref<2x128x128xf32, #tpu.memory_space<vmem>>, vector<1x128x128xf32>
    %9 = vector.shape_cast %8 : vector<1x128x128xf32> to vector<128x128xf32>
    %cst_10 = arith.constant dense<0.000000e+00> : vector<8x128xf32>
    %10 = tpu.matmul %7, %9, %cst_10 {dimension_numbers = #tpu.dot_dimension_numbers<[1], [0], [0], [1], [0, 0, 1, 1], [], []>} : vector<8x128xf32>, vector<128x128xf32>, vector<8x128xf32> -> vector<8x128xf32>
    %c0_11 = arith.constant 0 : index
    %c0_12 = arith.constant 0 : index
    %c0_13 = arith.constant 0 : index
    %11 = vector.load %arg5[%c0_11, %c0_12, %c0_13] : memref<2x128x128xf32, #tpu.memory_space<vmem>>, vector<1x128x128xf32>
    %12 = vector.shape_cast %11 : vector<1x128x128xf32> to vector<128x128xf32>
    %cst_14 = arith.constant dense<0.000000e+00> : vector<8x128xf32>
    %13 = tpu.matmul %7, %12, %cst_14 {dimension_numbers = #tpu.dot_dimension_numbers<[1], [0], [0], [1], [0, 0, 1, 1], [], []>} : vector<8x128xf32>, vector<128x128xf32>, vector<8x128xf32> -> vector<8x128xf32>
    %14 = arith.mulf %10, %13 : vector<8x128xf32>
    %c0_15 = arith.constant 0 : index
    %c0_16 = arith.constant 0 : index
    %c0_17 = arith.constant 0 : index
    %15 = vector.load %arg6[%c0_15, %c0_16, %c0_17] : memref<2x128x128xf32, #tpu.memory_space<vmem>>, vector<1x128x128xf32>
    %16 = vector.shape_cast %15 : vector<1x128x128xf32> to vector<128x128xf32>
    %cst_18 = arith.constant dense<0.000000e+00> : vector<8x128xf32>
    %17 = tpu.matmul %14, %16, %cst_18 {dimension_numbers = #tpu.dot_dimension_numbers<[1], [0], [0], [1], [0, 0, 1, 1], [], []>} : vector<8x128xf32>, vector<128x128xf32>, vector<8x128xf32> -> vector<8x128xf32>
    %cst_19 = arith.constant 1.000000e-01 : f32
    %18 = vector.broadcast %cst_19 : f32 to vector<8x128xf32>
    %19 = arith.mulf %18, %17 : vector<8x128xf32>
    %20 = arith.addf %19, %7 : vector<8x128xf32>
    %c0_20 = arith.constant 0 : index
    %c0_21 = arith.constant 0 : index
    %21 = vector.load %arg7[%c0_20, %c0_21] : memref<128x128xf32, #tpu.memory_space<vmem>>, vector<128x128xf32>
    %cst_22 = arith.constant dense<0.000000e+00> : vector<8x128xf32>
    %22 = tpu.matmul %20, %21, %cst_22 {dimension_numbers = #tpu.dot_dimension_numbers<[1], [0], [0], [1], [0, 0, 1, 1], [], []>} : vector<8x128xf32>, vector<128x128xf32>, vector<8x128xf32> -> vector<8x128xf32>
    %23 = arith.negf %22 : vector<8x128xf32>
    %24 = math.exp %23 : vector<8x128xf32>
    %cst_23 = arith.constant 1.000000e+00 : f32
    %25 = vector.broadcast %cst_23 : f32 to vector<8x128xf32>
    %26 = arith.addf %25, %24 : vector<8x128xf32>
    %27 = arith.divf %25, %26 : vector<8x128xf32>
    %28 = arith.mulf %27, %20 : vector<8x128xf32>
    %c0_24 = arith.constant 0 : index
    %c0_25 = arith.constant 0 : index
    %29 = vector.load %arg8[%c0_24, %c0_25] : memref<1x128xf32, #tpu.memory_space<vmem>>, vector<1x128xf32>
    %30 = vector.broadcast %29 : vector<1x128xf32> to vector<8x128xf32>
    %31 = arith.mulf %28, %30 : vector<8x128xf32>
    %c1 = arith.constant 1 : index
    %c0_26 = arith.constant 0 : index
    %c0_27 = arith.constant 0 : index
    %32 = vector.load %arg2[%c1, %c0_26, %c0_27] : memref<2x128x128xf32, #tpu.memory_space<vmem>>, vector<1x128x128xf32>
    %33 = vector.shape_cast %32 : vector<1x128x128xf32> to vector<128x128xf32>
    %cst_28 = arith.constant dense<0.000000e+00> : vector<8x128xf32>
    %34 = tpu.matmul %31, %33, %cst_28 {dimension_numbers = #tpu.dot_dimension_numbers<[1], [0], [0], [1], [0, 0, 1, 1], [], []>} : vector<8x128xf32>, vector<128x128xf32>, vector<8x128xf32> -> vector<8x128xf32>
    %c1_29 = arith.constant 1 : index
    %c0_30 = arith.constant 0 : index
    %c0_31 = arith.constant 0 : index
    %35 = vector.load %arg3[%c1_29, %c0_30, %c0_31] : memref<2x1x128xf32, #tpu.memory_space<vmem>>, vector<1x1x128xf32>
    %36 = vector.shape_cast %35 : vector<1x1x128xf32> to vector<1x128xf32>
    %37 = vector.broadcast %36 : vector<1x128xf32> to vector<8x128xf32>
    %38 = arith.addf %34, %37 : vector<8x128xf32>
    %c1_32 = arith.constant 1 : index
    %c0_33 = arith.constant 0 : index
    %c0_34 = arith.constant 0 : index
    %39 = vector.load %arg4[%c1_32, %c0_33, %c0_34] : memref<2x128x128xf32, #tpu.memory_space<vmem>>, vector<1x128x128xf32>
    %40 = vector.shape_cast %39 : vector<1x128x128xf32> to vector<128x128xf32>
    %cst_35 = arith.constant dense<0.000000e+00> : vector<8x128xf32>
    %41 = tpu.matmul %38, %40, %cst_35 {dimension_numbers = #tpu.dot_dimension_numbers<[1], [0], [0], [1], [0, 0, 1, 1], [], []>} : vector<8x128xf32>, vector<128x128xf32>, vector<8x128xf32> -> vector<8x128xf32>
    %c1_36 = arith.constant 1 : index
    %c0_37 = arith.constant 0 : index
    %c0_38 = arith.constant 0 : index
    %42 = vector.load %arg5[%c1_36, %c0_37, %c0_38] : memref<2x128x128xf32, #tpu.memory_space<vmem>>, vector<1x128x128xf32>
    %43 = vector.shape_cast %42 : vector<1x128x128xf32> to vector<128x128xf32>
    %cst_39 = arith.constant dense<0.000000e+00> : vector<8x128xf32>
    %44 = tpu.matmul %38, %43, %cst_39 {dimension_numbers = #tpu.dot_dimension_numbers<[1], [0], [0], [1], [0, 0, 1, 1], [], []>} : vector<8x128xf32>, vector<128x128xf32>, vector<8x128xf32> -> vector<8x128xf32>
    %45 = arith.mulf %41, %44 : vector<8x128xf32>
    %c1_40 = arith.constant 1 : index
    %c0_41 = arith.constant 0 : index
    %c0_42 = arith.constant 0 : index
    %46 = vector.load %arg6[%c1_40, %c0_41, %c0_42] : memref<2x128x128xf32, #tpu.memory_space<vmem>>, vector<1x128x128xf32>
    %47 = vector.shape_cast %46 : vector<1x128x128xf32> to vector<128x128xf32>
    %cst_43 = arith.constant dense<0.000000e+00> : vector<8x128xf32>
    %48 = tpu.matmul %45, %47, %cst_43 {dimension_numbers = #tpu.dot_dimension_numbers<[1], [0], [0], [1], [0, 0, 1, 1], [], []>} : vector<8x128xf32>, vector<128x128xf32>, vector<8x128xf32> -> vector<8x128xf32>
    %cst_44 = arith.constant 1.000000e-01 : f32
    %49 = vector.broadcast %cst_44 : f32 to vector<8x128xf32>
    %50 = arith.mulf %49, %48 : vector<8x128xf32>
    %51 = arith.addf %50, %38 : vector<8x128xf32>
    %c0_45 = arith.constant 0 : index
    %c0_46 = arith.constant 0 : index
    %52 = vector.load %arg7[%c0_45, %c0_46] : memref<128x128xf32, #tpu.memory_space<vmem>>, vector<128x128xf32>
    %cst_47 = arith.constant dense<0.000000e+00> : vector<8x128xf32>
    %53 = tpu.matmul %51, %52, %cst_47 {dimension_numbers = #tpu.dot_dimension_numbers<[1], [0], [0], [1], [0, 0, 1, 1], [], []>} : vector<8x128xf32>, vector<128x128xf32>, vector<8x128xf32> -> vector<8x128xf32>
    %54 = arith.negf %53 : vector<8x128xf32>
    %55 = math.exp %54 : vector<8x128xf32>
    %cst_48 = arith.constant 1.000000e+00 : f32
    %56 = vector.broadcast %cst_48 : f32 to vector<8x128xf32>
    %57 = arith.addf %56, %55 : vector<8x128xf32>
    %58 = arith.divf %56, %57 : vector<8x128xf32>
    %59 = arith.mulf %58, %51 : vector<8x128xf32>
    %c0_49 = arith.constant 0 : index
    %c0_50 = arith.constant 0 : index
    %60 = vector.load %arg8[%c0_49, %c0_50] : memref<1x128xf32, #tpu.memory_space<vmem>>, vector<1x128xf32>
    %61 = vector.broadcast %60 : vector<1x128xf32> to vector<8x128xf32>
    %62 = arith.mulf %59, %61 : vector<8x128xf32>
    %c0_51 = arith.constant 0 : index
    %c0_52 = arith.constant 0 : index
    %63 = vector.load %arg9[%c0_51, %c0_52] : memref<128x128xf32, #tpu.memory_space<vmem>>, vector<128x128xf32>
    %cst_53 = arith.constant dense<0.000000e+00> : vector<8x128xf32>
    %64 = tpu.matmul %62, %63, %cst_53 {dimension_numbers = #tpu.dot_dimension_numbers<[1], [0], [0], [1], [0, 0, 1, 1], [], []>} : vector<8x128xf32>, vector<128x128xf32>, vector<8x128xf32> -> vector<8x128xf32>
    %c0_54 = arith.constant 0 : index
    %c0_55 = arith.constant 0 : index
    %65 = vector.load %arg10[%c0_54, %c0_55] : memref<1x128xf32, #tpu.memory_space<vmem>>, vector<1x128xf32>
    %66 = vector.broadcast %65 : vector<1x128xf32> to vector<8x128xf32>
    %67 = arith.addf %64, %66 : vector<8x128xf32>
    %c0_56 = arith.constant 0 : index
    %c0_57 = arith.constant 0 : index
    %68 = vector.load %arg11[%c0_56, %c0_57] : memref<8x128xf32, #tpu.memory_space<vmem>>, vector<8x128xf32>
    tpu.vector_store %arg11[%c0_56, %c0_57], %67 {strides = array<i32>} : memref<8x128xf32, #tpu.memory_space<vmem>>, vector<8x128xf32>,
    return
  }
  func.func @transform_0(%arg0: i32) -> (i32, i32) {
    %c0_i32 = arith.constant 0 : i32
    %c0_i32_0 = arith.constant 0 : i32
    return %arg0, %c0_i32 : i32, i32
  }
  func.func @transform_1(%arg0: i32) -> (i32, i32, i32) {
    %c0_i32 = arith.constant 0 : i32
    %c0_i32_0 = arith.constant 0 : i32
    %c0_i32_1 = arith.constant 0 : i32
    %c0_i32_2 = arith.constant 0 : i32
    return %c0_i32, %c0_i32_0, %c0_i32_1 : i32, i32, i32
  }
  func.func @transform_2(%arg0: i32) -> (i32, i32, i32) {
    %c0_i32 = arith.constant 0 : i32
    %c0_i32_0 = arith.constant 0 : i32
    %c0_i32_1 = arith.constant 0 : i32
    %c0_i32_2 = arith.constant 0 : i32
    return %c0_i32, %c0_i32_0, %c0_i32_1 : i32, i32, i32
  }
  func.func @transform_3(%arg0: i32) -> (i32, i32, i32) {
    %c0_i32 = arith.constant 0 : i32
    %c0_i32_0 = arith.constant 0 : i32
    %c0_i32_1 = arith.constant 0 : i32
    %c0_i32_2 = arith.constant 0 : i32
    return %c0_i32, %c0_i32_0, %c0_i32_1 : i32, i32, i32
  }
  func.func @transform_4(%arg0: i32) -> (i32, i32, i32) {
    %c0_i32 = arith.constant 0 : i32
    %c0_i32_0 = arith.constant 0 : i32
    %c0_i32_1 = arith.constant 0 : i32
    %c0_i32_2 = arith.constant 0 : i32
    return %c0_i32, %c0_i32_0, %c0_i32_1 : i32, i32, i32
  }
  func.func @transform_5(%arg0: i32) -> (i32, i32, i32) {
    %c0_i32 = arith.constant 0 : i32
    %c0_i32_0 = arith.constant 0 : i32
    %c0_i32_1 = arith.constant 0 : i32
    %c0_i32_2 = arith.constant 0 : i32
    return %c0_i32, %c0_i32_0, %c0_i32_1 : i32, i32, i32
  }
  func.func @transform_6(%arg0: i32) -> (i32, i32) {
    %c0_i32 = arith.constant 0 : i32
    %c0_i32_0 = arith.constant 0 : i32
    %c0_i32_1 = arith.constant 0 : i32
    return %c0_i32, %c0_i32_0 : i32, i32
  }
  func.func @transform_7(%arg0: i32) -> (i32, i32) {
    %c0_i32 = arith.constant 0 : i32
    %c0_i32_0 = arith.constant 0 : i32
    %c0_i32_1 = arith.constant 0 : i32
    return %c0_i32, %c0_i32_0 : i32, i32
  }
  func.func @transform_8(%arg0: i32) -> (i32, i32) {
    %c0_i32 = arith.constant 0 : i32
    %c0_i32_0 = arith.constant 0 : i32
    %c0_i32_1 = arith.constant 0 : i32
    return %c0_i32, %c0_i32_0 : i32, i32
  }
  func.func @transform_9(%arg0: i32) -> (i32, i32) {
    %c0_i32 = arith.constant 0 : i32
    %c0_i32_0 = arith.constant 0 : i32
    %c0_i32_1 = arith.constant 0 : i32
    return %c0_i32, %c0_i32_0 : i32, i32
  }
  func.func @transform_10(%arg0: i32) -> (i32, i32) {
    %c0_i32 = arith.constant 0 : i32
    %c0_i32_0 = arith.constant 0 : i32
    return %arg0, %c0_i32 : i32, i32
  }
}

</mosaic_0001>

<bundles_post_ra>
// kernel: _emlp_forward_impl.1
= control target key start
LH: loop header
LB: loop body
LE: loop exit
PB: predicated region body
PF: predicated region fallthrough
CT: control target
= control target key end

     0   :  { %15 = vsyncpa [#allocation3], 0  ;;  %s2469_s0 = inlined_call_operand.vmem [shape: f32[8,128], index: 0, kind: input, shape index: {}]   ;;  %s2470_s1 = inlined_call_operand.hbm [shape: f32[2,128,128], index: 1, kind: input, shape index: {}]   ;;  %s2471_s2 = inlined_call_operand.vmem [shape: f32[2,1,128], index: 2, kind: input, shape index: {}]   ;;  %s2472_s3 = inlined_call_operand.hbm [shape: f32[2,128,128], index: 3, kind: input, shape index: {}]   ;;  %s2473_s4 = inlined_call_operand.hbm [shape: f32[2,128,128], index: 4, kind: input, shape index: {}]   ;;  %s2474_s5 = inlined_call_operand.hbm [shape: f32[2,128,128], index: 5, kind: input, shape index: {}]   ;;  %s2475_s6 = inlined_call_operand.hbm [shape: f32[128,128], index: 6, kind: input, shape index: {}]   ;;  %s2476_s7 = inlined_call_operand.vmem [shape: f32[1,128], index: 7, kind: input, shape index: {}]   ;;  %s2477_s8 = inlined_call_operand.hbm [shape: f32[128,128], index: 8, kind: input, shape index: {}]   ;;  %s2478_s9 = inlined_call_operand.vmem [shape: f32[1,128], index: 9, kind: input, shape index: {}]   ;;  %s2479_s10 = inlined_call_operand.vmem [shape: f32[8,128], index: 10, kind: output, shape index: {}]  }
   0x1   :  { %16 = vsyncpa [#allocation5], 0 }
   0x2   :  { %17 = vsyncpa [#allocation8], 0 }
   0x3   :  { %18 = vsyncpa [#allocation11], 0  ;;  %s2114_s13 = smov [#allocation4]   ;;  %s2115_s15 = smov [#allocation7]  }
   0x4   :  { %s40_s14 = sshll.u32 %s2114_s13, 4  ;;  %s64_s16 = sshll.u32 %s2115_s15, 4  ;;  %s41_s14 = int_to_ptr.vmem [resolvable:$true] %s40_s14  ;;  %s2180_s16 = int_to_ptr.vmem [resolvable:$true] %s64_s16 }
   0x5   :  { %s1974_s19 = scalar_lea.hbm %s2472_s3, 4096 }
   0x6   :  { %p1975_p0 = scmp.ne.s32.totalorder %s2472_s3, %s1974_s19  ;;  %p1978_p1 = scmp.lt.u32.totalorder %s1974_s19, %s2472_s3 }
   0x8   :  { %p1980_p2 = pnand %p1978_p1, %p1975_p0 }
   0xa   :  { %1983 = shalt.err (!%p1980_p2)
}
   0xb   :  { %s1984_s24 = scalar_lea.vmem %s41_s14, 4096  ;;  %p1989_p4 = scmp.lt.s32.totalorder %s41_s14, %s41_s14 }
   0xc   :  { %p1985_p3 = scmp.ne.s32.totalorder %s41_s14, %s1984_s24  ;;  %p1990_p5 = scmp.lt.s32.totalorder %s1984_s24, %s1984_s24 }
   0xe   :  { %p1991_p6 = por %p1990_p5, %p1989_p4 }
  0x10   :  { %p1992_p7 = pnand %p1991_p6, %p1985_p3 }
  0x12   :  { %1995 = shalt.err (!%p1992_p7)
}
  0x13   :  { %s2116_s25 = smov 128   ;;  %s2117_s26 = smov 8  }
  0x14   :  { %46 = dma.hbm_to_vmem [thread:$0]  %s2472_s3, 4096, %s41_s14, [#allocation5], %s2116_s25, %s2116_s25, %s2117_s26  }
  0x15   :  { %s1996_s11 = scalar_lea.hbm %s2474_s5, 4096 }
  0x16   :  { %p1997_p8 = scmp.ne.s32.totalorder %s2474_s5, %s1996_s11  ;;  %p2000_p9 = scmp.lt.u32.totalorder %s1996_s11, %s2474_s5 }
  0x18   :  { %p2002_p10 = pnand %p2000_p9, %p1997_p8 }
  0x1a   :  { %2005 = shalt.err (!%p2002_p10)
}
  0x1b   :  { %s2006_s18 = scalar_lea.vmem %s2180_s16, 4096  ;;  %p2011_p12 = scmp.lt.s32.totalorder %s2180_s16, %s2180_s16 }
  0x1c   :  { %p2007_p11 = scmp.ne.s32.totalorder %s2180_s16, %s2006_s18  ;;  %p2012_p13 = scmp.lt.s32.totalorder %s2006_s18, %s2006_s18 }
  0x1e   :  { %p2013_p0 = por %p2012_p13, %p2011_p12 }
  0x20   :  { %p2014_p1 = pnand %p2013_p0, %p2007_p11 }
  0x22   :  { %2017 = shalt.err (!%p2014_p1)
}
  0x23   :  { %70 = dma.hbm_to_vmem [thread:$0]  %s2474_s5, 4096, %s2180_s16, [#allocation8], %s2116_s25, %s2116_s25, %s2117_s26  }
  0x24   :  { %s2118_s19 = smov [#allocation2]   ;;  %s2119_s21 = smov [#allocation6]  }
  0x25   :  { %s26_s20 = sshll.u32 %s2118_s19, 4  ;;  %s52_s22 = sshll.u32 %s2119_s21, 4  ;;  %s27_s20 = int_to_ptr.vmem [resolvable:$true] %s26_s20  ;;  %s2217_s22 = int_to_ptr.vmem [resolvable:$true] %s52_s22 }
  0x26   :  { %s2018_s27 = scalar_lea.hbm %s2470_s1, 4096 }
  0x27   :  { %p2019_p2 = scmp.ne.s32.totalorder %s2470_s1, %s2018_s27  ;;  %p2022_p3 = scmp.lt.u32.totalorder %s2018_s27, %s2470_s1 }
  0x29   :  { %p2024_p4 = pnand %p2022_p3, %p2019_p2 }
  0x2b   :  { %2027 = shalt.err (!%p2024_p4)
}
  0x2c   :  { %s2028_s5 = scalar_lea.vmem %s27_s20, 4096  ;;  %p2033_p6 = scmp.lt.s32.totalorder %s27_s20, %s27_s20 }
  0x2d   :  { %p2029_p5 = scmp.ne.s32.totalorder %s27_s20, %s2028_s5  ;;  %p2034_p7 = scmp.lt.s32.totalorder %s2028_s5, %s2028_s5 }
  0x2f   :  { %p2035_p8 = por %p2034_p7, %p2033_p6 }
  0x31   :  { %p2036_p9 = pnand %p2035_p8, %p2029_p5 }
  0x33   :  { %2039 = shalt.err (!%p2036_p9)
}
  0x34   :  { %32 = dma.hbm_to_vmem [thread:$0]  %s2470_s1, 4096, %s27_s20, [#allocation3], %s2116_s25, %s2116_s25, %s2117_s26  }
  0x35   :  { %s2040_s17 = scalar_lea.hbm %s2473_s4, 4096 }
  0x36   :  { %p2041_p10 = scmp.ne.s32.totalorder %s2473_s4, %s2040_s17  ;;  %p2044_p11 = scmp.lt.u32.totalorder %s2040_s17, %s2473_s4 }
  0x38   :  { %p2046_p12 = pnand %p2044_p11, %p2041_p10 }
  0x3a   :  { %2049 = shalt.err (!%p2046_p12)
}
  0x3b   :  { %s2050_s21 = scalar_lea.vmem %s2217_s22, 4096  ;;  %p2055_p0 = scmp.lt.s32.totalorder %s2217_s22, %s2217_s22 }
  0x3c   :  { %p2051_p13 = scmp.ne.s32.totalorder %s2217_s22, %s2050_s21  ;;  %p2056_p1 = scmp.lt.s32.totalorder %s2050_s21, %s2050_s21 }
  0x3e   :  { %p2057_p2 = por %p2056_p1, %p2055_p0 }
  0x40   :  { %p2058_p3 = pnand %p2057_p2, %p2051_p13 }
  0x42   :  { %2061 = shalt.err (!%p2058_p3)
}
  0x43   :  { %58 = dma.hbm_to_vmem [thread:$0]  %s2473_s4, 4096, %s2217_s22, [#allocation5], %s2116_s25, %s2116_s25, %s2117_s26  }
  0x44   :  { %s2120_s23 = smov [#allocation9]   ;;  %s2121_s27 = smov [#allocation10]  }
  0x45   :  { %s76_s24 = sshll.u32 %s2120_s23, 4  ;;  %s90_s28 = sshll.u32 %s2121_s27, 4  ;;  %s77_s24 = int_to_ptr.vmem [resolvable:$true] %s76_s24  ;;  %s2254_s28 = int_to_ptr.vmem [resolvable:$true] %s90_s28 }
  0x46   :  { %s2062_s11 = scalar_lea.hbm %s2475_s6, 2048 }
  0x47   :  { %p2063_p4 = scmp.ne.s32.totalorder %s2475_s6, %s2062_s11  ;;  %p2066_p5 = scmp.lt.u32.totalorder %s2062_s11, %s2475_s6 }
  0x49   :  { %p2068_p6 = pnand %p2066_p5, %p2063_p4 }
  0x4b   :  { %2071 = shalt.err (!%p2068_p6)
}
  0x4c   :  { %s2072_s4 = scalar_lea.vmem %s77_s24, 2048  ;;  %p2077_p8 = scmp.lt.s32.totalorder %s77_s24, %s77_s24 }
  0x4d   :  { %p2073_p7 = scmp.ne.s32.totalorder %s77_s24, %s2072_s4  ;;  %p2078_p9 = scmp.lt.s32.totalorder %s2072_s4, %s2072_s4 }
  0x4f   :  { %p2079_p10 = por %p2078_p9, %p2077_p8 }
  0x51   :  { %p2080_p11 = pnand %p2079_p10, %p2073_p7 }
  0x53   :  { %2083 = shalt.err (!%p2080_p11)
}
  0x54   :  { %82 = dma.hbm_to_vmem [thread:$0]  %s2475_s6, 2048, %s77_s24, [#allocation8], %s2116_s25, %s2116_s25, %s2117_s26  }
  0x55   :  { %s2084_s3 = scalar_lea.hbm %s2477_s8, 2048 }
  0x56   :  { %p2085_p12 = scmp.ne.s32.totalorder %s2477_s8, %s2084_s3  ;;  %p2088_p13 = scmp.lt.u32.totalorder %s2084_s3, %s2477_s8 }
  0x58   :  { %p2090_p0 = pnand %p2088_p13, %p2085_p12 }
  0x5a   :  { %2093 = shalt.err (!%p2090_p0)
}
  0x5b   :  { %s2094_s20 = scalar_lea.vmem %s2254_s28, 2048  ;;  %p2099_p2 = scmp.lt.s32.totalorder %s2254_s28, %s2254_s28 }
  0x5c   :  { %p2095_p1 = scmp.ne.s32.totalorder %s2254_s28, %s2094_s20  ;;  %p2100_p3 = scmp.lt.s32.totalorder %s2094_s20, %s2094_s20 }
  0x5e   :  { %p2101_p4 = por %p2100_p3, %p2099_p2 }
  0x60   :  { %p2102_p5 = pnand %p2101_p4, %p2095_p1 }
  0x62   :  { %2105 = shalt.err (!%p2102_p5)
}
  0x63   :  { %96 = dma.hbm_to_vmem [thread:$0]  %s2477_s8, 2048, %s2254_s28, [#allocation11], %s2116_s25, %s2116_s25, %s2117_s26  }
  0x64   :  { %2106 = dma.done.wait [#allocation3], 4096  }
  0x65   :  { %2107 = vsyncadd [#allocation3], 4294963200 }
  0x66   :  { %2108 = dma.done.wait [#allocation5], 8192  }
  0x67   :  { %2109 = vsyncadd [#allocation5], 4294959104 }
  0x68   :  { %2110 = dma.done.wait [#allocation8], 6144  }
  0x69   :  { %2111 = vsyncadd [#allocation8], 4294961152 }
  0x6a   :  { %2112 = dma.done.wait [#allocation11], 2048  }
  0x6b   :  { %2113 = vsyncadd [#allocation11], 4294965248  ;;  %v2122_v0 = vmov 0.0|0.0   ;;  %vm2123_vm0 = vmmov 0   ;;  %v2124_v1 = vmov 0.0   ;;  %v118_v2 = vld [vmem:[#allocation2] sm:$0xff] }
  0x6c   :  { %1691 = vmatprep.subr.bf16.mxu0 %v2122_v0  ;;  %1338 = vmatprep.mubr.msk.f32.mxu0 %vm2123_vm0, %v2124_v1  ;;  %v119_v3 = vld [vmem:[#allocation2 + $0x8] sm:$0xff]  ;;  %v120_v4 = vld [vmem:[#allocation2 + $0x10] sm:$0xff]  ;;  %v121_v6 = vld [vmem:[#allocation2 + $0x18] sm:$0xff] }
  0x6d   :  { %1715 = vmatprep.subr.bf16.mxu1 %v2122_v0  ;;  %1373 = vmatprep.mubr.msk.f32.mxu1 %vm2123_vm0, %v2124_v1  ;;  %v1692_v5 = vpack.c.bf16 %v119_v3, %v118_v2  ;;  %v1695_v7 = vpack.c.bf16 %v121_v6, %v120_v4  ;;  %v122_v8 = vld [vmem:[#allocation2 + $0x20] sm:$0xff]  ;;  %v123_v9 = vld [vmem:[#allocation2 + $0x28] sm:$0xff]  ;;  %v213_v14 = vld [vmem:[#allocation4 + $0x10] sm:$0xff] }
  0x6e   :  { %v211_v10 = vld [vmem:[#allocation4] sm:$0xff]  ;;  %v212_v11 = vld [vmem:[#allocation4 + $0x8] sm:$0xff]  ;;  %v1698_v12 = vpack.c.bf16 %v123_v9, %v122_v8  ;;  %v214_v15 = vld [vmem:[#allocation4 + $0x18] sm:$0xff] }
  0x6f   :  { %1693 = vmatpush3.bf16.msra.mxu0 %v1692_v5  ;;  %v1716_v13 = vpack.c.bf16 %v212_v11, %v211_v10  ;;  %v124_v16 = vld [vmem:[#allocation2 + $0x30] sm:$0xff]  ;;  %v125_v17 = vld [vmem:[#allocation2 + $0x38] sm:$0xff]  ;;  %v1719_v18 = vpack.c.bf16 %v214_v15, %v213_v14  ;;  %v215_v19 = vld [vmem:[#allocation4 + $0x20] sm:$0xff] }
  0x70   :  { %1694 = vmatprep.subr.bf16.mxu0 %v2122_v0  ;;  %v216_v20 = vld [vmem:[#allocation4 + $0x28] sm:$0xff]  ;;  %v1701_v21 = vpack.c.bf16 %v125_v17, %v124_v16  ;;  %v126_v22 = vld [vmem:[#allocation2 + $0x40] sm:$0xff]  ;;  %v217_v25 = vld [vmem:[#allocation4 + $0x30] sm:$0xff] }
  0x71   :  { %1717 = vmatpush3.bf16.msra.mxu1 %v1716_v13  ;;  %v127_v23 = vld [vmem:[#allocation2 + $0x48] sm:$0xff]  ;;  %v1722_v24 = vpack.c.bf16 %v216_v20, %v215_v19  ;;  %v218_v26 = vld [vmem:[#allocation4 + $0x38] sm:$0xff]  ;;  %v128_v28 = vld [vmem:[#allocation2 + $0x50] sm:$0xff] }
  0x72   :  { %1718 = vmatprep.subr.bf16.mxu1 %v2122_v0  ;;  %v1704_v27 = vpack.c.bf16 %v127_v23, %v126_v22  ;;  %v129_v29 = vld [vmem:[#allocation2 + $0x58] sm:$0xff]  ;;  %v1725_v30 = vpack.c.bf16 %v218_v26, %v217_v25  ;;  %v219_v31 = vld [vmem:[#allocation4 + $0x40] sm:$0xff]  ;;  %v220_v32 = vld [vmem:[#allocation4 + $0x48] sm:$0xff] }
  0x73   :  { %1696 = vmatpush3.bf16.msra.mxu0 %v1695_v7  ;;  %v1707_v33 = vpack.c.bf16 %v129_v29, %v128_v28  ;;  %v130_v34 = vld [vmem:[#allocation2 + $0x60] sm:$0xff]  ;;  %v131_v35 = vld [vmem:[#allocation2 + $0x68] sm:$0xff]  ;;  %v1728_v36 = vpack.c.bf16 %v220_v32, %v219_v31  ;;  %v221_v37 = vld [vmem:[#allocation4 + $0x50] sm:$0xff] }
  0x74   :  { %1697 = vmatprep.subr.bf16.mxu0 %v2122_v0  ;;  %v222_v38 = vld [vmem:[#allocation4 + $0x58] sm:$0xff]  ;;  %v1710_v39 = vpack.c.bf16 %v131_v35, %v130_v34  ;;  %v132_v40 = vld [vmem:[#allocation2 + $0x70] sm:$0xff]  ;;  %v223_v43 = vld [vmem:[#allocation4 + $0x60] sm:$0xff] }
  0x75   :  { %1720 = vmatpush3.bf16.msra.mxu1 %v1719_v18  ;;  %v133_v41 = vld [vmem:[#allocation2 + $0x78] sm:$0xff]  ;;  %v1731_v42 = vpack.c.bf16 %v222_v38, %v221_v37  ;;  %v224_v44 = vld [vmem:[#allocation4 + $0x68] sm:$0xff]  ;;  %v297_v46 = vld [vmem:[#allocation6] sm:$0xff] }
  0x76   :  { %1721 = vmatprep.subr.bf16.mxu1 %v2122_v0  ;;  %v1713_v45 = vpack.c.bf16 %v133_v41, %v132_v40  ;;  %v298_v47 = vld [vmem:[#allocation6 + $0x8] sm:$0xff]  ;;  %v1734_v48 = vpack.c.bf16 %v224_v44, %v223_v43  ;;  %v117_v49 = vld [vmem:[%s2469_s0] sm:$0xff]  ;;  %v299_v51 = vld [vmem:[#allocation6 + $0x10] sm:$0xff] }
  0x77   :  { %1699 = vmatpush3.bf16.msra.mxu0 %v1698_v12  ;;  %v1740_v50 = vpack.c.bf16 %v298_v47, %v297_v46  ;;  %v300_v52 = vld [vmem:[#allocation6 + $0x18] sm:$0xff]  ;;  %v301_v54 = vld [vmem:[#allocation6 + $0x20] sm:$0xff]  ;;  %v302_v55 = vld [vmem:[#allocation6 + $0x28] sm:$0xff] }
  0x78   :  { %1700 = vmatprep.subr.bf16.mxu0 %v2122_v0  ;;  %v1743_v53 = vpack.c.bf16 %v300_v52, %v299_v51  ;;  %v1746_v56 = vpack.c.bf16 %v302_v55, %v301_v54  ;;  %v303_v57 = vld [vmem:[#allocation6 + $0x30] sm:$0xff]  ;;  %v304_v58 = vld [vmem:[#allocation6 + $0x38] sm:$0xff]  ;;  %v305_v60 = vld [vmem:[#allocation6 + $0x40] sm:$0xff] }
  0x79   :  { %1723 = vmatpush3.bf16.msra.mxu1 %v1722_v24  ;;  %v1749_v59 = vpack.c.bf16 %v304_v58, %v303_v57  ;;  %v306_v61 = vld [vmem:[#allocation6 + $0x48] sm:$0xff]  ;;  %v307_v63 = vld [vmem:[#allocation6 + $0x50] sm:$0xff]  ;;  %v308_v2 = vld [vmem:[#allocation6 + $0x58] sm:$0xff] }
  0x7a   :  { %1724 = vmatprep.subr.bf16.mxu1 %v2122_v0  ;;  %v1752_v62 = vpack.c.bf16 %v306_v61, %v305_v60  ;;  %v1755_v3 = vpack.c.bf16 %v308_v2, %v307_v63  ;;  %v309_v4 = vld [vmem:[#allocation6 + $0x60] sm:$0xff]  ;;  %v310_v5 = vld [vmem:[#allocation6 + $0x68] sm:$0xff]  ;;  %v225_v7 = vld [vmem:[#allocation4 + $0x70] sm:$0xff] }
  0x7b   :  { %1702 = vmatpush3.bf16.msra.mxu0 %v1701_v21  ;;  %v1758_v6 = vpack.c.bf16 %v310_v5, %v309_v4  ;;  %v226_v8 = vld [vmem:[#allocation4 + $0x78] sm:$0xff]  ;;  %v311_v9 = vld [vmem:[#allocation6 + $0x70] sm:$0xff]  ;;  %v384_v13 = vld [vmem:[#allocation7] sm:$0xff] }
  0x7c   :  { %1703 = vmatprep.subr.bf16.mxu0 %v2122_v0  ;;  %v1737_v10 = vpack.c.bf16 %v226_v8, %v225_v7  ;;  %v312_v11 = vld [vmem:[#allocation6 + $0x78] sm:$0xff]  ;;  %v385_v14 = vld [vmem:[#allocation7 + $0x8] sm:$0xff]  ;;  %v1112_v15 = vld [vmem:[%s2471_s2] ss:$0 sm:$0xff] }
  0x7d   :  { %1726 = vmatpush3.bf16.msra.mxu1 %v1725_v30  ;;  %v1761_v12 = vpack.c.bf16 %v312_v11, %v311_v9  ;;  %v1764_v17 = vpack.c.bf16 %v385_v14, %v384_v13  ;;  %v386_v20 = vld [vmem:[#allocation7 + $0x10] sm:$0xff]  ;;  %v387_v21 = vld [vmem:[#allocation7 + $0x18] sm:$0xff]  ;;  %v388_v23 = vld [vmem:[#allocation7 + $0x20] sm:$0xff] }
  0x7e   :  { %1727 = vmatprep.subr.bf16.mxu1 %v2122_v0  ;;  %v1767_v22 = vpack.c.bf16 %v387_v21, %v386_v20  ;;  %v389_v24 = vld [vmem:[#allocation7 + $0x28] sm:$0xff]  ;;  %v390_v26 = vld [vmem:[#allocation7 + $0x30] sm:$0xff]  ;;  %v392_v29 = vld [vmem:[#allocation7 + $0x40] sm:$0xff] }
  0x7f   :  { %1705 = vmatpush3.bf16.msra.mxu0 %v1704_v27  ;;  %v1770_v25 = vpack.c.bf16 %v389_v24, %v388_v23  ;;  %v391_v27 = vld [vmem:[#allocation7 + $0x38] sm:$0xff]  ;;  %v393_v30 = vld [vmem:[#allocation7 + $0x48] sm:$0xff]  ;;  %v394_v32 = vld [vmem:[#allocation7 + $0x50] sm:$0xff] }
  0x80   :  { %1706 = vmatprep.subr.bf16.mxu0 %v2122_v0  ;;  %v1773_v28 = vpack.c.bf16 %v391_v27, %v390_v26  ;;  %v1776_v31 = vpack.c.bf16 %v393_v30, %v392_v29  ;;  %v396_v35 = vld [vmem:[#allocation7 + $0x60] sm:$0xff]  ;;  %v398_v38 = vld [vmem:[#allocation7 + $0x70] sm:$0xff]  ;;  %v479_v51 = vld [vmem:[#allocation9 + $0x38] sm:$0xff] }
  0x81   :  { %1729 = vmatpush3.bf16.msra.mxu1 %v1728_v36  ;;  %v397_v36 = vld [vmem:[#allocation7 + $0x68] sm:$0xff]  ;;  %v472_v41 = vld [vmem:[#allocation9] sm:$0xff]  ;;  %v474_v43 = vld [vmem:[#allocation9 + $0x10] sm:$0xff] }
  0x82   :  { %1730 = vmatprep.subr.bf16.mxu1 %v2122_v0  ;;  %v1782_v37 = vpack.c.bf16 %v397_v36, %v396_v35  ;;  %v476_v47 = vld [vmem:[#allocation9 + $0x20] sm:$0xff]  ;;  %v481_v54 = vld [vmem:[#allocation9 + $0x48] sm:$0xff]  ;;  %v483_v57 = vld [vmem:[#allocation9 + $0x58] sm:$0xff] }
  0x83   :  { %1708 = vmatpush3.bf16.msra.mxu0 %v1707_v33  ;;  %v395_v33 = vld [vmem:[#allocation7 + $0x58] sm:$0xff]  ;;  %v485_v60 = vld [vmem:[#allocation9 + $0x68] sm:$0xff]  ;;  %v486_v5 = vld [vmem:[#allocation9 + $0x70] sm:$0xff] }
  0x84   :  { %1709 = vmatprep.subr.bf16.mxu0 %v2122_v0  ;;  %v1779_v34 = vpack.c.bf16 %v395_v33, %v394_v32  ;;  %v575_v13 = vld [vmem:[#allocation2 + $0x88] sm:$0xff]  ;;  %v580_v21 = vld [vmem:[#allocation2 + $0xb0] sm:$0xff]  ;;  %v582_v24 = vld [vmem:[#allocation2 + $0xc0] sm:$0xff] }
  0x85   :  { %1732 = vmatpush3.bf16.msra.mxu1 %v1731_v42  ;;  %v473_v42 = vld [vmem:[#allocation9 + $0x8] sm:$0xff]  ;;  %v584_v27 = vld [vmem:[#allocation2 + $0xd0] sm:$0xff]  ;;  %v586_v30 = vld [vmem:[#allocation2 + $0xe0] sm:$0xff] }
  0x86   :  { %1733 = vmatprep.subr.bf16.mxu1 %v2122_v0  ;;  %v2345_v44 = vpack.c.bf16 %v473_v42, %v472_v41  ;;  %v588_v33 = vld [vmem:[#allocation2 + $0xf0] sm:$0xff]  ;;  %v669_v36 = vld [vmem:[#allocation4 + $0x80] sm:$0xff] }
  0x87   :  { %1711 = vmatpush3.bf16.msra.mxu0 %v1710_v39  ;;  %v399_v39 = vld [vmem:[#allocation7 + $0x78] sm:$0xff]  ;;  %v673_v42 = vld [vmem:[#allocation4 + $0xa0] sm:$0xff] }
  0x88   :  { %1712 = vmatprep.subr.bf16.mxu0 %v2122_v0  ;;  %v1785_v40 = vpack.c.bf16 %v399_v39, %v398_v38  ;;  %v671_v39 = vld [vmem:[#allocation4 + $0x90] sm:$0xff] }
  0x89   :  { %1735 = vmatpush3.bf16.msra.mxu1 %v1734_v48  ;;  %v477_v48 = vld [vmem:[#allocation9 + $0x28] sm:$0xff] }
  0x8a   :  { %1736 = vmatprep.subr.bf16.mxu1 %v2122_v0 }
  0x8b   :  { %1714 = vmatpush3.bf16.msra.mxu0 %v1713_v45  ;;  %v475_v45 = vld [vmem:[#allocation9 + $0x18] sm:$0xff] }
  0x8c   :  { %1739 = vmatprep.subr.bf16.mxu0 %v2122_v0  ;;  %v2348_v46 = vpack.c.bf16 %v475_v45, %v474_v43  ;;  %v674_v43 = vld [vmem:[#allocation4 + $0xa8] sm:$0xff] }
  0x8d   :  { %1738 = vmatpush3.bf16.msra.mxu1 %v1737_v10  ;;  %v1842_v45 = vpack.c.bf16 %v674_v43, %v673_v42 }
  0x8e   :  { %1339 = vmatmul.mubr.f32.vlgmr.msra.gmra.mrb[0].mxu0 %v117_v49  ;;  %1763 = vmatprep.subr.bf16.mxu1 %v2122_v0  ;;  %v2352_v49 = vpack.c.bf16 %v477_v48, %v476_v47  ;;  %v675_v47 = vld [vmem:[#allocation4 + $0xb0] sm:$0xff]  ;;  %v676_v48 = vld [vmem:[#allocation4 + $0xb8] sm:$0xff] }
  0x8f   :  { %1741 = vmatpush3.bf16.msra.mxu0 %v1740_v50  ;;  %1408 = vmatprep.mubr.msk.f32.mxu0 %vm2123_vm0, %v2124_v1  ;;  %v478_v50 = vld [vmem:[#allocation9 + $0x30] sm:$0xff] }
  0x90   :  { %1742 = vmatprep.subr.bf16.mxu0 %v2122_v0  ;;  %v2356_v52 = vpack.c.bf16 %v479_v51, %v478_v50  ;;  %v1845_v50 = vpack.c.bf16 %v676_v48, %v675_v47  ;;  %v677_v51 = vld [vmem:[#allocation4 + $0xc0] sm:$0xff]  ;;  %v846_v48 = vld [vmem:[#allocation7 + $0x90] sm:$0xff] }
  0x93   :  { %1744 = vmatpush3.bf16.msra.mxu0 %v1743_v53  ;;  %v480_v53 = vld [vmem:[#allocation9 + $0x40] sm:$0xff] }
  0x94   :  { %1745 = vmatprep.subr.bf16.mxu0 %v2122_v0  ;;  %v2360_v55 = vpack.c.bf16 %v481_v54, %v480_v53  ;;  %v678_v53 = vld [vmem:[#allocation4 + $0xc8] sm:$0xff] }
  0x95   :  { %v1848_v54 = vpack.c.bf16 %v678_v53, %v677_v51  ;;  %v848_v53 = vld [vmem:[#allocation7 + $0xa0] sm:$0xff] }
  0x97   :  { %1747 = vmatpush3.bf16.msra.mxu0 %v1746_v56  ;;  %v482_v56 = vld [vmem:[#allocation9 + $0x50] sm:$0xff] }
  0x98   :  { %1748 = vmatprep.subr.bf16.mxu0 %v2122_v0  ;;  %v2364_v58 = vpack.c.bf16 %v483_v57, %v482_v56  ;;  %v679_v56 = vld [vmem:[#allocation4 + $0xd0] sm:$0xff]  ;;  %v680_v57 = vld [vmem:[#allocation4 + $0xd8] sm:$0xff] }
  0x9b   :  { %1750 = vmatpush3.bf16.msra.mxu0 %v1749_v59  ;;  %v484_v59 = vld [vmem:[#allocation9 + $0x60] sm:$0xff] }
  0x9c   :  { %1751 = vmatprep.subr.bf16.mxu0 %v2122_v0  ;;  %v2368_v61 = vpack.c.bf16 %v485_v60, %v484_v59  ;;  %v1851_v59 = vpack.c.bf16 %v680_v57, %v679_v56  ;;  %v681_v60 = vld [vmem:[#allocation4 + $0xe0] sm:$0xff]  ;;  %v850_v57 = vld [vmem:[#allocation7 + $0xb0] sm:$0xff] }
  0x9f   :  { %1753 = vmatpush3.bf16.msra.mxu0 %v1752_v62 }
  0xa0   :  { %1754 = vmatprep.subr.bf16.mxu0 %v2122_v0 }
  0xa3   :  { %1756 = vmatpush3.bf16.msra.mxu0 %v1755_v3 }
  0xa4   :  { %1757 = vmatprep.subr.bf16.mxu0 %v2122_v0 }
  0xa7   :  { %1759 = vmatpush3.bf16.msra.mxu0 %v1758_v6  ;;  %v487_v6 = vld [vmem:[#allocation9 + $0x78] sm:$0xff] }
  0xa8   :  { %1760 = vmatprep.subr.bf16.mxu0 %v2122_v0  ;;  %v2375_v7 = vpack.c.bf16 %v487_v6, %v486_v5 }
  0xab   :  { %1762 = vmatpush3.bf16.msra.mxu0 %v1761_v12  ;;  %v574_v12 = vld [vmem:[#allocation2 + $0x80] sm:$0xff] }
  0xac   :  { %1787 = vmatprep.subr.bf16.mxu0 %v2122_v0  ;;  %v1812_v14 = vpack.c.bf16 %v575_v13, %v574_v12  ;;  %v2403_v12 = vld [vmem:[%s2476_s7] ss:$0 sm:$0xff] }
 0x161   :  { %v207_v16 = vpop.f32.mrb[0].mxu0 }
 0x162   :  { %v2329_v18 = vadd.f32 %v1112_v15, %v207_v16  ;;  %v1340_v19 = vpop.f32.mrb[1].mxu0  ;;  %v576_v15 = vld [vmem:[#allocation2 + $0x90] sm:$0xff]  ;;  %v577_v16 = vld [vmem:[#allocation2 + $0x98] sm:$0xff] }
 0x163   :  { %v578_v19 = vld [vmem:[#allocation2 + $0xa0] sm:$0xff] }
 0x164   :  { %1374 = vmatmul.mubr.f32.vlgmr.msra.gmra.mrb[0].mxu1 %v2329_v18  ;;  %1409 = vmatmul.mubr.f32.vlgmr.msra.gmra.mrb[2].mxu0 %v2329_v18 }
 0x165   :  { %1765 = vmatpush3.bf16.msra.mxu1 %v1764_v17  ;;  %1443 = vmatprep.mubr.msk.f32.mxu1 %vm2123_vm0, %v2124_v1  ;;  %v1815_v17 = vpack.c.bf16 %v577_v16, %v576_v15  ;;  %v758_v16 = vld [vmem:[#allocation6 + $0x90] sm:$0xff] }
 0x166   :  { %1766 = vmatprep.subr.bf16.mxu1 %v2122_v0  ;;  %1478 = vmatprep.mubr.msk.f32.mxu0 %vm2123_vm0, %v2124_v1 }
 0x167   :  { %1789 = vmatpush3.bf16.msra.mxu0 %v2345_v44 }
 0x168   :  { %1790 = vmatprep.subr.bf16.mxu0 %v2122_v0 }
 0x169   :  { %1768 = vmatpush3.bf16.msra.mxu1 %v1767_v22  ;;  %v581_v22 = vld [vmem:[#allocation2 + $0xb8] sm:$0xff] }
 0x16a   :  { %1769 = vmatprep.subr.bf16.mxu1 %v2122_v0  ;;  %v1821_v23 = vpack.c.bf16 %v581_v22, %v580_v21  ;;  %v763_v22 = vld [vmem:[#allocation6 + $0xb8] sm:$0xff] }
 0x16b   :  { %1792 = vmatpush3.bf16.msra.mxu0 %v2348_v46 }
 0x16c   :  { %1793 = vmatprep.subr.bf16.mxu0 %v2122_v0 }
 0x16d   :  { %1771 = vmatpush3.bf16.msra.mxu1 %v1770_v25  ;;  %v583_v25 = vld [vmem:[#allocation2 + $0xc8] sm:$0xff] }
 0x16e   :  { %1772 = vmatprep.subr.bf16.mxu1 %v2122_v0  ;;  %v1824_v26 = vpack.c.bf16 %v583_v25, %v582_v24  ;;  %v764_v24 = vld [vmem:[#allocation6 + $0xc0] sm:$0xff]  ;;  %v765_v25 = vld [vmem:[#allocation6 + $0xc8] sm:$0xff] }
 0x16f   :  { %1795 = vmatpush3.bf16.msra.mxu0 %v2352_v49 }
 0x170   :  { %1796 = vmatprep.subr.bf16.mxu0 %v2122_v0 }
 0x171   :  { %1774 = vmatpush3.bf16.msra.mxu1 %v1773_v28  ;;  %v585_v28 = vld [vmem:[#allocation2 + $0xd8] sm:$0xff] }
 0x172   :  { %1775 = vmatprep.subr.bf16.mxu1 %v2122_v0  ;;  %v1827_v29 = vpack.c.bf16 %v585_v28, %v584_v27  ;;  %v766_v27 = vld [vmem:[#allocation6 + $0xd0] sm:$0xff]  ;;  %v767_v28 = vld [vmem:[#allocation6 + $0xd8] sm:$0xff] }
 0x173   :  { %1798 = vmatpush3.bf16.msra.mxu0 %v2356_v52 }
 0x174   :  { %1799 = vmatprep.subr.bf16.mxu0 %v2122_v0 }
 0x175   :  { %1777 = vmatpush3.bf16.msra.mxu1 %v1776_v31  ;;  %v587_v31 = vld [vmem:[#allocation2 + $0xe8] sm:$0xff] }
 0x176   :  { %1778 = vmatprep.subr.bf16.mxu1 %v2122_v0  ;;  %v1830_v32 = vpack.c.bf16 %v587_v31, %v586_v30  ;;  %v768_v30 = vld [vmem:[#allocation6 + $0xe0] sm:$0xff]  ;;  %v769_v31 = vld [vmem:[#allocation6 + $0xe8] sm:$0xff] }
 0x177   :  { %1801 = vmatpush3.bf16.msra.mxu0 %v2360_v55 }
 0x178   :  { %1802 = vmatprep.subr.bf16.mxu0 %v2122_v0 }
 0x179   :  { %1780 = vmatpush3.bf16.msra.mxu1 %v1779_v34  ;;  %v589_v34 = vld [vmem:[#allocation2 + $0xf8] sm:$0xff] }
 0x17a   :  { %1781 = vmatprep.subr.bf16.mxu1 %v2122_v0  ;;  %v1833_v35 = vpack.c.bf16 %v589_v34, %v588_v33  ;;  %v683_v33 = vld [vmem:[#allocation4 + $0xf0] sm:$0xff]  ;;  %v684_v34 = vld [vmem:[#allocation4 + $0xf8] sm:$0xff] }
 0x17b   :  { %1804 = vmatpush3.bf16.msra.mxu0 %v2364_v58 }
 0x17c   :  { %1805 = vmatprep.subr.bf16.mxu0 %v2122_v0 }
 0x17d   :  { %1783 = vmatpush3.bf16.msra.mxu1 %v1782_v37  ;;  %v670_v37 = vld [vmem:[#allocation4 + $0x88] sm:$0xff] }
 0x17e   :  { %1784 = vmatprep.subr.bf16.mxu1 %v2122_v0  ;;  %v1836_v38 = vpack.c.bf16 %v670_v37, %v669_v36  ;;  %v1857_v36 = vpack.c.bf16 %v684_v34, %v683_v33  ;;  %v771_v37 = vld [vmem:[#allocation6 + $0xf8] sm:$0xff]  ;;  %v1023_v33 = vld [vmem:[#allocation10 + $0x68] sm:$0xff] }
 0x17f   :  { %1807 = vmatpush3.bf16.msra.mxu0 %v2368_v61 }
 0x180   :  { %1808 = vmatprep.subr.bf16.mxu0 %v2122_v0 }
 0x181   :  { %1786 = vmatpush3.bf16.msra.mxu1 %v1785_v40  ;;  %v672_v40 = vld [vmem:[#allocation4 + $0x98] sm:$0xff] }
 0x182   :  { %1811 = vmatprep.subr.bf16.mxu1 %v2122_v0  ;;  %v1839_v41 = vpack.c.bf16 %v672_v40, %v671_v39  ;;  %v844_v39 = vld [vmem:[#allocation7 + $0x80] sm:$0xff]  ;;  %v845_v40 = vld [vmem:[#allocation7 + $0x88] sm:$0xff] }
 0x183   :  { %1810 = vmatpush3.bf16.msra.mxu0 %v2375_v7  ;;  %v1884_v43 = vpack.c.bf16 %v845_v40, %v844_v39 }
 0x184   :  { %1835 = vmatprep.subr.bf16.mxu0 %v2122_v0 }
 0x237   :  { %v293_v62 = vpop.f32.mrb[0].mxu1  ;;  %v379_v63 = vpop.f32.mrb[2].mxu0 }
 0x238   :  { %v383_v2 = vmul.f32 %v379_v63, %v293_v62  ;;  %v1375_v3 = vpop.f32.mrb[1].mxu1  ;;  %v1410_v4 = vpop.f32.mrb[3].mxu0  ;;  %v682_v62 = vld [vmem:[#allocation4 + $0xe8] sm:$0xff] }
 0x239   :  { %v1854_v63 = vpack.c.bf16 %v682_v62, %v681_v60  ;;  %v853_v62 = vld [vmem:[#allocation7 + $0xc8] sm:$0xff] }
 0x23a   :  { %1444 = vmatmul.mubr.f32.vlgmr.msra.gmra.mrb[2].mxu1 %v383_v2 }
 0x23b   :  { %1513 = vmatprep.mubr.msk.f32.mxu1 %vm2123_vm0, %v2124_v1  ;;  %1813 = vmatpush3.bf16.msra.mxu1 %v1812_v14 }
 0x23c   :  { %1814 = vmatprep.subr.bf16.mxu1 %v2122_v0 }
 0x23f   :  { %1816 = vmatpush3.bf16.msra.mxu1 %v1815_v17  ;;  %v759_v17 = vld [vmem:[#allocation6 + $0x98] sm:$0xff] }
 0x240   :  { %1817 = vmatprep.subr.bf16.mxu1 %v2122_v0 }
 0x30d   :  { %v466_v8 = vpop.f32.mrb[2].mxu1 }
 0x30e   :  { %v470_v9 = vmul.f32 0.1, %v466_v8  ;;  %v1445_v10 = vpop.f32.mrb[3].mxu1  ;;  %v756_v8 = vld [vmem:[#allocation6 + $0x80] sm:$0xff] }
 0x310   :  { %v2380_v11 = vadd.f32 %v470_v9, %v2329_v18  ;;  %v579_v18 = vld [vmem:[#allocation2 + $0xa8] sm:$0xff] }
 0x311   :  { %v1818_v20 = vpack.c.bf16 %v579_v18, %v578_v19  ;;  %v757_v9 = vld [vmem:[#allocation6 + $0x88] sm:$0xff]  ;;  %v1863_v19 = vpack.c.bf16 %v759_v17, %v758_v16  ;;  %v760_v18 = vld [vmem:[#allocation6 + $0xa0] sm:$0xff] }
 0x312   :  { %1479 = vmatmul.mubr.f32.vlgmr.msra.gmra.mrb[4].mxu0 %v2380_v11  ;;  %v1860_v14 = vpack.c.bf16 %v757_v9, %v756_v8  ;;  %v1010_v16 = vld [vmem:[#allocation10] sm:$0xff]  ;;  %v1011_v17 = vld [vmem:[#allocation10 + $0x8] sm:$0xff] }
 0x313   :  { %1548 = vmatprep.mubr.msk.f32.mxu0 %vm2123_vm0, %v2124_v1  ;;  %1819 = vmatpush3.bf16.msra.mxu1 %v1818_v20  ;;  %v761_v20 = vld [vmem:[#allocation6 + $0xa8] sm:$0xff] }
 0x314   :  { %1820 = vmatprep.subr.bf16.mxu1 %v2122_v0  ;;  %1837 = vmatpush3.bf16.msra.mxu0 %v1836_v38  ;;  %v1866_v21 = vpack.c.bf16 %v761_v20, %v760_v18  ;;  %v1012_v18 = vld [vmem:[#allocation10 + $0x10] sm:$0xff]  ;;  %v1013_v20 = vld [vmem:[#allocation10 + $0x18] sm:$0xff] }
 0x315   :  { %1838 = vmatprep.subr.bf16.mxu0 %v2122_v0 }
 0x317   :  { %1822 = vmatpush3.bf16.msra.mxu1 %v1821_v23 }
 0x318   :  { %1823 = vmatprep.subr.bf16.mxu1 %v2122_v0  ;;  %1840 = vmatpush3.bf16.msra.mxu0 %v1839_v41  ;;  %v1116_v41 = vld [vmem:[%s2471_s2 + $0x1] ss:$0 sm:$0xff] }
 0x319   :  { %1841 = vmatprep.subr.bf16.mxu0 %v2122_v0 }
 0x31b   :  { %1825 = vmatpush3.bf16.msra.mxu1 %v1824_v26  ;;  %v1872_v26 = vpack.c.bf16 %v765_v25, %v764_v24  ;;  %v1017_v24 = vld [vmem:[#allocation10 + $0x38] sm:$0xff] }
 0x31c   :  { %1826 = vmatprep.subr.bf16.mxu1 %v2122_v0  ;;  %1843 = vmatpush3.bf16.msra.mxu0 %v1842_v45 }
 0x31d   :  { %1844 = vmatprep.subr.bf16.mxu0 %v2122_v0 }
 0x31f   :  { %1828 = vmatpush3.bf16.msra.mxu1 %v1827_v29  ;;  %v1875_v29 = vpack.c.bf16 %v767_v28, %v766_v27  ;;  %v1019_v27 = vld [vmem:[#allocation10 + $0x48] sm:$0xff] }
 0x320   :  { %1829 = vmatprep.subr.bf16.mxu1 %v2122_v0  ;;  %1846 = vmatpush3.bf16.msra.mxu0 %v1845_v50  ;;  %v847_v50 = vld [vmem:[#allocation7 + $0x98] sm:$0xff] }
 0x321   :  { %1847 = vmatprep.subr.bf16.mxu0 %v2122_v0  ;;  %v1887_v51 = vpack.c.bf16 %v847_v50, %v846_v48  ;;  %v1118_v48 = vld [vmem:[%s2478_s9] ss:$0 sm:$0xff] }
 0x323   :  { %1831 = vmatpush3.bf16.msra.mxu1 %v1830_v32  ;;  %v1878_v32 = vpack.c.bf16 %v769_v31, %v768_v30  ;;  %v1021_v30 = vld [vmem:[#allocation10 + $0x58] sm:$0xff] }
 0x324   :  { %1832 = vmatprep.subr.bf16.mxu1 %v2122_v0  ;;  %1849 = vmatpush3.bf16.msra.mxu0 %v1848_v54  ;;  %v849_v54 = vld [vmem:[#allocation7 + $0xa8] sm:$0xff] }
 0x325   :  { %1850 = vmatprep.subr.bf16.mxu0 %v2122_v0  ;;  %v1890_v56 = vpack.c.bf16 %v849_v54, %v848_v53 }
 0x327   :  { %1834 = vmatpush3.bf16.msra.mxu1 %v1833_v35  ;;  %v770_v35 = vld [vmem:[#allocation6 + $0xf0] sm:$0xff] }
 0x328   :  { %1859 = vmatprep.subr.bf16.mxu1 %v2122_v0  ;;  %1852 = vmatpush3.bf16.msra.mxu0 %v1851_v59  ;;  %v1881_v38 = vpack.c.bf16 %v771_v37, %v770_v35  ;;  %v851_v59 = vld [vmem:[#allocation7 + $0xb8] sm:$0xff]  ;;  %v1024_v35 = vld [vmem:[#allocation10 + $0x70] sm:$0xff] }
 0x329   :  { %1853 = vmatprep.subr.bf16.mxu0 %v2122_v0  ;;  %v1893_v60 = vpack.c.bf16 %v851_v59, %v850_v57 }
 0x32c   :  { %1855 = vmatpush3.bf16.msra.mxu0 %v1854_v63 }
 0x32d   :  { %1856 = vmatprep.subr.bf16.mxu0 %v2122_v0 }
 0x330   :  { %1858 = vmatpush3.bf16.msra.mxu0 %v1857_v36  ;;  %v1025_v36 = vld [vmem:[#allocation10 + $0x78] sm:$0xff] }
 0x331   :  { %1883 = vmatprep.subr.bf16.mxu0 %v2122_v0  ;;  %v1953_v37 = vpack.c.bf16 %v1025_v36, %v1024_v35 }
 0x3e5   :  { %v554_v2 = vpop.f32.mrb[4].mxu0 }
 0x3e6   :  { %v1113_v3 = vmul.f32 -1.442695, %v554_v2  ;;  %v1480_v4 = vpop.f32.mrb[5].mxu0  ;;  %v854_v2 = vld [vmem:[#allocation7 + $0xd0] sm:$0xff] }
 0x3e7   :  { %v856_v4 = vld [vmem:[#allocation7 + $0xe0] sm:$0xff] }
 0x3e8   :  { %1966 = vpow2.f32 %v1113_v3  ;;  %v855_v3 = vld [vmem:[#allocation7 + $0xd8] sm:$0xff] }
 0x3f2   :  { %v1967_v5 = vpop.eup %1966 }
 0x3f3   :  { %v561_v6 = vadd.f32 1.0, %v1967_v5  ;;  %v857_v5 = vld [vmem:[#allocation7 + $0xe8] sm:$0xff] }
 0x3f5   :  { %1968 = vrcp.f32 %v561_v6 }
 0x3ff   :  { %v1969_v10 = vpop.eup %1968 }
 0x400   :  { %v564_v13 = vmul.f32 %v1969_v10, %v2380_v11  ;;  %v762_v11 = vld [vmem:[#allocation6 + $0xb0] sm:$0xff] }
 0x401   :  { %v1869_v23 = vpack.c.bf16 %v763_v22, %v762_v11  ;;  %v1014_v11 = vld [vmem:[#allocation10 + $0x20] sm:$0xff] }
 0x402   :  { %v572_v15 = vmul.f32 %v2403_v12, %v564_v13 }
 0x404   :  { %1514 = vmatmul.mubr.f32.vlgmr.msra.gmra.mrb[4].mxu1 %v572_v15 }
 0x405   :  { %1861 = vmatpush3.bf16.msra.mxu1 %v1860_v14  ;;  %1583 = vmatprep.mubr.msk.f32.mxu1 %vm2123_vm0, %v2124_v1 }
 0x406   :  { %1862 = vmatprep.subr.bf16.mxu1 %v2122_v0 }
 0x409   :  { %1864 = vmatpush3.bf16.msra.mxu1 %v1863_v19  ;;  %v1932_v19 = vpack.c.bf16 %v1011_v17, %v1010_v16 }
 0x40a   :  { %1865 = vmatprep.subr.bf16.mxu1 %v2122_v0 }
 0x40d   :  { %1867 = vmatpush3.bf16.msra.mxu1 %v1866_v21  ;;  %v1935_v21 = vpack.c.bf16 %v1013_v20, %v1012_v18 }
 0x40e   :  { %1868 = vmatprep.subr.bf16.mxu1 %v2122_v0 }
 0x411   :  { %1870 = vmatpush3.bf16.msra.mxu1 %v1869_v23  ;;  %v1016_v23 = vld [vmem:[#allocation10 + $0x30] sm:$0xff] }
 0x412   :  { %1871 = vmatprep.subr.bf16.mxu1 %v2122_v0  ;;  %v1941_v25 = vpack.c.bf16 %v1017_v24, %v1016_v23 }
 0x415   :  { %1873 = vmatpush3.bf16.msra.mxu1 %v1872_v26  ;;  %v1018_v26 = vld [vmem:[#allocation10 + $0x40] sm:$0xff] }
 0x416   :  { %1874 = vmatprep.subr.bf16.mxu1 %v2122_v0  ;;  %v1944_v28 = vpack.c.bf16 %v1019_v27, %v1018_v26 }
 0x419   :  { %1876 = vmatpush3.bf16.msra.mxu1 %v1875_v29  ;;  %v1020_v29 = vld [vmem:[#allocation10 + $0x50] sm:$0xff] }
 0x41a   :  { %1877 = vmatprep.subr.bf16.mxu1 %v2122_v0  ;;  %v1947_v31 = vpack.c.bf16 %v1021_v30, %v1020_v29 }
 0x41d   :  { %1879 = vmatpush3.bf16.msra.mxu1 %v1878_v32  ;;  %v1022_v32 = vld [vmem:[#allocation10 + $0x60] sm:$0xff] }
 0x41e   :  { %1880 = vmatprep.subr.bf16.mxu1 %v2122_v0  ;;  %v1950_v34 = vpack.c.bf16 %v1023_v33, %v1022_v32 }
 0x421   :  { %1882 = vmatpush3.bf16.msra.mxu1 %v1881_v38 }
 0x422   :  { %1907 = vmatprep.subr.bf16.mxu1 %v2122_v0 }
 0x4d7   :  { %v664_v42 = vpop.f32.mrb[4].mxu1 }
 0x4d8   :  { %v2421_v45 = vadd.f32 %v1116_v41, %v664_v42  ;;  %v1515_v47 = vpop.f32.mrb[5].mxu1 }
 0x4da   :  { %1549 = vmatmul.mubr.f32.vlgmr.msra.gmra.mrb[6].mxu0 %v2421_v45  ;;  %1584 = vmatmul.mubr.f32.vlgmr.msra.gmra.mrb[6].mxu1 %v2421_v45 }
 0x4db   :  { %1885 = vmatpush3.bf16.msra.mxu0 %v1884_v43  ;;  %1618 = vmatprep.mubr.msk.f32.mxu0 %vm2123_vm0, %v2124_v1 }
 0x4dc   :  { %1886 = vmatprep.subr.bf16.mxu0 %v2122_v0  ;;  %1909 = vmatpush3.bf16.msra.mxu1 %v2345_v44  ;;  %v852_v44 = vld [vmem:[#allocation7 + $0xc0] sm:$0xff] }
 0x4dd   :  { %1910 = vmatprep.subr.bf16.mxu1 %v2122_v0  ;;  %1653 = vmatprep.mubr.msk.f32.mxu1 %vm2123_vm0, %v2124_v1  ;;  %v1896_v63 = vpack.c.bf16 %v853_v62, %v852_v44 }
 0x4df   :  { %1888 = vmatpush3.bf16.msra.mxu0 %v1887_v51 }
 0x4e0   :  { %1889 = vmatprep.subr.bf16.mxu0 %v2122_v0  ;;  %1912 = vmatpush3.bf16.msra.mxu1 %v2348_v46  ;;  %v1899_v46 = vpack.c.bf16 %v855_v3, %v854_v2 }
 0x4e1   :  { %1913 = vmatprep.subr.bf16.mxu1 %v2122_v0 }
 0x4e3   :  { %1891 = vmatpush3.bf16.msra.mxu0 %v1890_v56 }
 0x4e4   :  { %1892 = vmatprep.subr.bf16.mxu0 %v2122_v0  ;;  %1915 = vmatpush3.bf16.msra.mxu1 %v2352_v49  ;;  %v1902_v49 = vpack.c.bf16 %v857_v5, %v856_v4 }
 0x4e5   :  { %1916 = vmatprep.subr.bf16.mxu1 %v2122_v0 }
 0x4e7   :  { %1894 = vmatpush3.bf16.msra.mxu0 %v1893_v60 }
 0x4e8   :  { %1895 = vmatprep.subr.bf16.mxu0 %v2122_v0  ;;  %1918 = vmatpush3.bf16.msra.mxu1 %v2356_v52  ;;  %v858_v52 = vld [vmem:[#allocation7 + $0xf0] sm:$0xff] }
 0x4e9   :  { %1919 = vmatprep.subr.bf16.mxu1 %v2122_v0 }
 0x4eb   :  { %1897 = vmatpush3.bf16.msra.mxu0 %v1896_v63 }
 0x4ec   :  { %1898 = vmatprep.subr.bf16.mxu0 %v2122_v0  ;;  %1921 = vmatpush3.bf16.msra.mxu1 %v2360_v55  ;;  %v859_v55 = vld [vmem:[#allocation7 + $0xf8] sm:$0xff] }
 0x4ed   :  { %1922 = vmatprep.subr.bf16.mxu1 %v2122_v0  ;;  %v1905_v6 = vpack.c.bf16 %v859_v55, %v858_v52 }
 0x4ef   :  { %1900 = vmatpush3.bf16.msra.mxu0 %v1899_v46 }
 0x4f0   :  { %1901 = vmatprep.subr.bf16.mxu0 %v2122_v0  ;;  %1924 = vmatpush3.bf16.msra.mxu1 %v2364_v58 }
 0x4f1   :  { %1925 = vmatprep.subr.bf16.mxu1 %v2122_v0 }
 0x4f3   :  { %1903 = vmatpush3.bf16.msra.mxu0 %v1902_v49 }
 0x4f4   :  { %1904 = vmatprep.subr.bf16.mxu0 %v2122_v0  ;;  %1927 = vmatpush3.bf16.msra.mxu1 %v2368_v61 }
 0x4f5   :  { %1928 = vmatprep.subr.bf16.mxu1 %v2122_v0 }
 0x4f7   :  { %1906 = vmatpush3.bf16.msra.mxu0 %v1905_v6 }
 0x4f8   :  { %1930 = vmatpush3.bf16.msra.mxu1 %v2375_v7  ;;  %1931 = vmatprep.subr.bf16.mxu0 %v2122_v0 }
 0x5ad   :  { %v751_v8 = vpop.f32.mrb[6].mxu0  ;;  %v838_v9 = vpop.f32.mrb[6].mxu1 }
 0x5ae   :  { %v842_v58 = vmul.f32 %v838_v9, %v751_v8  ;;  %v1550_v10 = vpop.f32.mrb[7].mxu0  ;;  %v1585_v13 = vpop.f32.mrb[7].mxu1 }
 0x5b0   :  { %1619 = vmatmul.mubr.f32.vlgmr.msra.gmra.mrb[8].mxu0 %v842_v58 }
 0x5b1   :  { %1688 = vmatprep.mubr.msk.f32.mxu0 %vm2123_vm0, %v2124_v1  ;;  %1933 = vmatpush3.bf16.msra.mxu0 %v1932_v19  ;;  %v1015_v1 = vld [vmem:[#allocation10 + $0x28] sm:$0xff] }
 0x5b2   :  { %1934 = vmatprep.subr.bf16.mxu0 %v2122_v0  ;;  %v1938_v22 = vpack.c.bf16 %v1015_v1, %v1014_v11 }
 0x5b5   :  { %1936 = vmatpush3.bf16.msra.mxu0 %v1935_v21 }
 0x5b6   :  { %1937 = vmatprep.subr.bf16.mxu0 %v2122_v0 }
 0x5b9   :  { %1939 = vmatpush3.bf16.msra.mxu0 %v1938_v22 }
 0x5ba   :  { %1940 = vmatprep.subr.bf16.mxu0 %v2122_v0 }
 0x5bd   :  { %1942 = vmatpush3.bf16.msra.mxu0 %v1941_v25 }
 0x5be   :  { %1943 = vmatprep.subr.bf16.mxu0 %v2122_v0 }
 0x5c1   :  { %1945 = vmatpush3.bf16.msra.mxu0 %v1944_v28 }
 0x5c2   :  { %1946 = vmatprep.subr.bf16.mxu0 %v2122_v0 }
 0x5c5   :  { %1948 = vmatpush3.bf16.msra.mxu0 %v1947_v31 }
 0x5c6   :  { %1949 = vmatprep.subr.bf16.mxu0 %v2122_v0 }
 0x5c9   :  { %1951 = vmatpush3.bf16.msra.mxu0 %v1950_v34 }
 0x5ca   :  { %1952 = vmatprep.subr.bf16.mxu0 %v2122_v0 }
 0x5cd   :  { %1954 = vmatpush3.bf16.msra.mxu0 %v1953_v37 }
 0x683   :  { %v926_v61 = vpop.f32.mrb[8].mxu0 }
 0x684   :  { %v930_v14 = vmul.f32 0.1, %v926_v61  ;;  %v1620_v15 = vpop.f32.mrb[9].mxu0 }
 0x686   :  { %v931_v7 = vadd.f32 %v930_v14, %v2421_v45 }
 0x688   :  { %1654 = vmatmul.mubr.f32.vlgmr.msra.gmra.mrb[8].mxu1 %v931_v7 }
 0x75b   :  { %v998_v38 = vpop.f32.mrb[8].mxu1 }
 0x75c   :  { %v1117_v39 = vmul.f32 -1.442695, %v998_v38  ;;  %v1655_v40 = vpop.f32.mrb[9].mxu1 }
 0x75e   :  { %1970 = vpow2.f32 %v1117_v39 }
 0x768   :  { %v1971_v41 = vpop.eup %1970 }
 0x769   :  { %v1005_v42 = vadd.f32 1.0, %v1971_v41 }
 0x76b   :  { %1972 = vrcp.f32 %v1005_v42 }
 0x775   :  { %v1973_v43 = vpop.eup %1972 }
 0x776   :  { %v1008_v45 = vmul.f32 %v1973_v43, %v931_v7 }
 0x778   :  { %v1009_v47 = vmul.f32 %v2403_v12, %v1008_v45 }
 0x77a   :  { %1689 = vmatmul.mubr.f32.vlgmr.msra.gmra.mrb[10].mxu0 %v1009_v47 }
 0x84d   :  { %v1099_v50 = vpop.f32.mrb[10].mxu0 }
 0x84e   :  { %v1100_v51 = vadd.f32 %v1118_v48, %v1099_v50  ;;  %v1690_v0 = vpop.f32.mrb[11].mxu0 }
 0x850   :  { %1103 = vst [vmem:[%s2479_s10] sm:$0xff] %v1100_v51 }
 0x851   :  { %1108 = vsyncpa [#allocation3], 1 }
 0x852   :  { %1109 = vsyncpa [#allocation5], 1 }
 0x853   :  { %1110 = vsyncpa [#allocation8], 1 }
 0x854   :  { %1111 = vsyncpa [#allocation11], 1 }

</bundles_post_ra>
